<compile_context>
chip_gen: v6e
topology: v6e:2x2x1
jax: 0.10.0
libtpu: 0.0.40
codegen_flags: <defaults>
</compile_context>

<pallas_src>
import math
import functools

import jax
import jax.numpy as jnp
from jax import lax
from jax.experimental import pallas as pl
from jax.experimental.pallas import tpu as pltpu

LOG_STD_MAX = 1.0
LOG_STD_MIN = -5.0
DENOM = max(abs(LOG_STD_MIN), LOG_STD_MAX)  # 5.0


def _gelu(x, approx=False):
    if approx:
        # tanh approximation: transcendental runs on the EUP slot (opt-in,
        # slightly different numerics from torch.nn.GELU(approximate='none')).
        c = math.sqrt(2.0 / math.pi)
        return 0.5 * x * (1.0 + jnp.tanh(c * (x + 0.044715 * x * x * x)))
    # Exact GELU (torch.nn.GELU default): 0.5*x*(1+erf(x/sqrt(2)))
    return 0.5 * x * (1.0 + lax.erf(x * (1.0 / math.sqrt(2.0))))


def actor_kernel(x_ref, w_in_ref, w_sh_ref, w_h1_ref, w_h2_ref, w_h3_ref,
                 b_sh_ref, b_h1_ref, b_h2_ref, b_h3_ref, out_ref,
                 *, hidden, a_pad, gelu_approx):
    H = hidden

    def dot(a, w):
        # Cast only the matmul operands to the (possibly bf16) weight dtype;
        # accumulate in f32 on the MXU.
        return jnp.dot(a.astype(w.dtype), w, preferred_element_type=jnp.float32)

    x = x_ref[...]

    # ---- shared network: (Linear -> GELU) x 3 -------------------------------
    h = _gelu(dot(x, w_in_ref[...]) + b_sh_ref[0], gelu_approx)
    h = _gelu(dot(h, w_sh_ref[0]) + b_sh_ref[1], gelu_approx)
    h = _gelu(dot(h, w_sh_ref[1]) + b_sh_ref[2], gelu_approx)

    # ---- head layer 1: fused mean||std concat weight (H, 2H), no padding ----
    g = _gelu(dot(h, w_h1_ref[...]) + b_h1_ref[...], gelu_approx)       # (B, 2H)

    # ---- head layer 2: two real (B,H)@(H,H) dots on the halves ---------------
    gm = _gelu(dot(g[:, :H], w_h2_ref[0]) + b_h2_ref[0], gelu_approx)   # (B, H)
    gs = _gelu(dot(g[:, H:], w_h2_ref[1]) + b_h2_ref[1], gelu_approx)   # (B, H)

    # ---- head layer 3: (B,H)@(H,A_pad), A_pad = round_up(action_dim, 128) ----
    mean = dot(gm, w_h3_ref[0]) + b_h3_ref[0]                           # (B, A_pad)
    z = dot(gs, w_h3_ref[1]) + b_h3_ref[1]                              # (B, A_pad)

    # log_std squashing (only on the log_std lanes):
    #   clamp_min(max*tanh(x/d), 0) + clamp_max(-min*tanh(x/d), 0)
    t = jnp.tanh(z * (1.0 / DENOM))
    sq = jnp.maximum(LOG_STD_MAX * t, 0.0) + jnp.minimum(-LOG_STD_MIN * t, 0.0)

    # Lane-dense stores to disjoint 128-aligned ranges of the padded output.
    out_ref[:, :a_pad] = mean.astype(out_ref.dtype)
    out_ref[:, a_pad:] = sq.astype(out_ref.dtype)


def init_actor_params(key, input_dim, action_dim, hidden):
    """Deterministic synthetic per-layer params. Weights stored as (in, out)."""
    def linear_params(k, fan_in, fan_out):
        k1, k2 = jax.random.split(k)
        bound = 1.0 / math.sqrt(fan_in)  # matches nn.Linear default init range
        w = jax.random.uniform(k1, (fan_in, fan_out), jnp.float32, -bound, bound)
        b = jax.random.uniform(k2, (1, fan_out), jnp.float32, -bound, bound)
        return w, b

    keys = jax.random.split(key, 9)
    params = []
    # shared
    params += linear_params(keys[0], input_dim, hidden)
    params += linear_params(keys[1], hidden, hidden)
    params += linear_params(keys[2], hidden, hidden)
    # mean head
    params += linear_params(keys[3], hidden, hidden)
    params += linear_params(keys[4], hidden, hidden)
    params += linear_params(keys[5], hidden, action_dim)
    # std head
    params += linear_params(keys[6], hidden, hidden)
    params += linear_params(keys[7], hidden, hidden)
    params += linear_params(keys[8], hidden, action_dim)
    return tuple(params)


def pack_actor_params(params, action_dim, hidden, matmul_dtype=jnp.float32):
    """Pack the 18 per-layer tensors into 9 stacked, unpadded (except the last
    dim of the output heads, which is lane-padded to a multiple of 128)
    operands for the kernel.  Only matmul weights are cast to matmul_dtype;
    biases stay f32 (added to the f32 MXU accumulator)."""
    (w1, b1, w2, b2, w3, b3,
     wm1, bm1, wm2, bm2, wm3, bm3,
     ws1, bs1, ws2, bs2, ws3, bs3) = params
    H, A = hidden, action_dim
    a_pad = 128 * ((A + 127) // 128)
    padc = a_pad - A

    wdt = matmul_dtype
    w_in = w1.astype(wdt)                                              # (I, H)
    w_sh = jnp.stack([w2, w3]).astype(wdt)                             # (2, H, H)
    w_h1 = jnp.concatenate([wm1, ws1], axis=1).astype(wdt)             # (H, 2H)
    w_h2 = jnp.stack([wm2, ws2]).astype(wdt)                           # (2, H, H)
    w_h3 = jnp.stack([jnp.pad(wm3, ((0, 0), (0, padc))),
                      jnp.pad(ws3, ((0, 0), (0, padc)))]).astype(wdt)  # (2, H, A_pad)

    b_sh = jnp.stack([b1, b2, b3]).astype(jnp.float32)                 # (3, 1, H)
    b_h1 = jnp.concatenate([bm1, bs1], axis=1).astype(jnp.float32)     # (1, 2H)
    b_h2 = jnp.stack([bm2, bs2]).astype(jnp.float32)                   # (2, 1, H)
    b_h3 = jnp.stack([jnp.pad(bm3, ((0, 0), (0, padc))),
                      jnp.pad(bs3, ((0, 0), (0, padc)))]
                     ).astype(jnp.float32)                             # (2, 1, A_pad)

    return (w_in, w_sh, w_h1, w_h2, w_h3, b_sh, b_h1, b_h2, b_h3)


def _pick_batch_tile(batch):
    # Prefer a tile that leaves >= 2 grid steps (v7x dual-TC megacore).
    for cand in (512, 256, 128, 64, 32, 16, 8):
        if batch % cand == 0 and batch // cand >= 2:
            return cand
    for cand in (512, 256, 128, 64, 32, 16, 8):
        if batch % cand == 0:
            return cand
    return batch  # tiny / odd batches: single whole-batch block


@functools.partial(jax.jit, static_argnames=("action_dim", "gelu_approx"))
def actor_forward(state, packed_params, action_dim, gelu_approx=False):
    (w_in, w_sh, w_h1, w_h2, w_h3, b_sh, b_h1, b_h2, b_h3) = packed_params
    batch, input_dim = state.shape
    hidden = w_in.shape[1]
    a_pad = w_h3.shape[-1]
    H2 = 2 * hidden

    tile_b = _pick_batch_tile(batch)
    grid = (batch // tile_b,)

    kernel = functools.partial(actor_kernel, hidden=hidden, a_pad=a_pad,
                               gelu_approx=gelu_approx)

    # VMEM budget: weights/biases (double-buffered by the pipeliner), 2x state
    # tile, 2x output tile, plus generous activation scratch.  Clamped to the
    # [32 MiB, 64 MiB] range so it is safe on v5e/v6e/v7x.
    param_bytes = sum(int(p.size) * p.dtype.itemsize
                      for p in (w_in, w_sh, w_h1, w_h2, w_h3,
                                b_sh, b_h1, b_h2, b_h3))
    io_bytes = tile_b * (input_dim + 2 * a_pad) * 4
    act_bytes = 8 * tile_b * max(H2, 2 * a_pad) * 4
    vmem_limit = int(min(max(2 * param_bytes + 2 * io_bytes + act_bytes,
                             32 << 20), 64 << 20))

    fused = pl.pallas_call(
        kernel,
        out_shape=jax.ShapeDtypeStruct((batch, 2 * a_pad), jnp.float32),
        grid_spec=pltpu.PrefetchScalarGridSpec(
            num_scalar_prefetch=0,
            grid=grid,
            in_specs=[
                # state: tiled over the batch grid (pipelined)
                pl.BlockSpec((tile_b, input_dim), lambda i: (i, 0)),
                # weights / biases: whole-array blocks, resident across steps
                pl.BlockSpec(w_in.shape, lambda i: (0, 0)),
                pl.BlockSpec(w_sh.shape, lambda i: (0, 0, 0)),
                pl.BlockSpec(w_h1.shape, lambda i: (0, 0)),
                pl.BlockSpec(w_h2.shape, lambda i: (0, 0, 0)),
                pl.BlockSpec(w_h3.shape, lambda i: (0, 0, 0)),
                pl.BlockSpec(b_sh.shape, lambda i: (0, 0, 0)),
                pl.BlockSpec(b_h1.shape, lambda i: (0, 0)),
                pl.BlockSpec(b_h2.shape, lambda i: (0, 0, 0)),
                pl.BlockSpec(b_h3.shape, lambda i: (0, 0, 0)),
            ],
            out_specs=pl.BlockSpec((tile_b, 2 * a_pad), lambda i: (i, 0)),
        ),
        compiler_params=pltpu.CompilerParams(
            dimension_semantics=("parallel",),
            vmem_limit_bytes=vmem_limit),
    )(state, w_in, w_sh, w_h1, w_h2, w_h3, b_sh, b_h1, b_h2, b_h3)

    mean = fused[:, :action_dim]
    log_std = fused[:, a_pad:a_pad + action_dim]
    return mean, log_std


def actor_forward_ref(state, params):
    """Plain-JAX reference of the same forward pass (unpacked, per-layer)."""
    (w1, b1, w2, b2, w3, b3,
     wm1, bm1, wm2, bm2, wm3, bm3,
     ws1, bs1, ws2, bs2, ws3, bs3) = params

    def gelu(x):
        return 0.5 * x * (1.0 + lax.erf(x / math.sqrt(2.0)))

    h = gelu(state @ w1 + b1)
    h = gelu(h @ w2 + b2)
    h = gelu(h @ w3 + b3)
    m = gelu(h @ wm1 + bm1)
    m = gelu(m @ wm2 + bm2)
    mean = m @ wm3 + bm3
    s = gelu(h @ ws1 + bs1)
    s = gelu(s @ ws2 + bs2)
    ls = s @ ws3 + bs3
    t = jnp.tanh(ls / DENOM)
    log_std = jnp.maximum(LOG_STD_MAX * t, 0.0) + jnp.minimum(-LOG_STD_MIN * t, 0.0)
    return mean, log_std


if __name__ == "__main__":
    # Small shapes consistent with the module's forward: state [batch, input_dim]
    batch, input_dim, hidden, action_dim = 8, 16, 32, 8

    key = jax.random.PRNGKey(0)
    k_params, k_state = jax.random.split(key)
    params = init_actor_params(k_params, input_dim, action_dim, hidden)
    state = jax.random.normal(k_state, (batch, input_dim), dtype=jnp.float32)

    mean_ref, log_std_ref = actor_forward_ref(state, params)

    # --- f32 matmul path: exact parity with the PyTorch module --------------
    packed_f32 = pack_actor_params(params, action_dim, hidden, jnp.float32)
    mean, log_std = actor_forward(state, packed_f32, action_dim)
    jax.block_until_ready((mean, log_std))
    assert mean.shape == (batch, action_dim) and log_std.shape == (batch, action_dim)
    assert jnp.allclose(mean, mean_ref, atol=1e-5, rtol=1e-5)
    assert jnp.allclose(log_std, log_std_ref, atol=1e-5, rtol=1e-5)

    # --- bf16 matmul path: perf lever on v5e/v6e/v7x (relaxed tolerance) ----
    packed_bf16 = pack_actor_params(params, action_dim, hidden, jnp.bfloat16)
    mean_b, log_std_b = actor_forward(state, packed_bf16, action_dim)
    jax.block_until_ready((mean_b, log_std_b))
    assert jnp.allclose(mean_b, mean_ref, atol=1e-1, rtol=1e-1)
    assert jnp.allclose(log_std_b, log_std_ref, atol=1e-1, rtol=1e-1)

    print("KERNEL_OK")
</pallas_src>

<mosaic_0001>
module attributes {stable_mosaic.version = 11 : i64} {
  func.func @actor_kernel(%arg0: i32, %arg1: memref<8x16xf32, #tpu.memory_space<vmem>>, %arg2: memref<16x32xf32, #tpu.memory_space<vmem>>, %arg3: memref<2x32x32xf32, #tpu.memory_space<vmem>>, %arg4: memref<32x64xf32, #tpu.memory_space<vmem>>, %arg5: memref<2x32x32xf32, #tpu.memory_space<vmem>>, %arg6: memref<2x32x128xf32, #tpu.memory_space<vmem>>, %arg7: memref<3x1x32xf32, #tpu.memory_space<vmem>>, %arg8: memref<1x64xf32, #tpu.memory_space<vmem>>, %arg9: memref<2x1x32xf32, #tpu.memory_space<vmem>>, %arg10: memref<2x1x128xf32, #tpu.memory_space<vmem>>, %arg11: memref<8x256xf32, #tpu.memory_space<vmem>>) attributes {dimension_semantics = [#tpu.dimension_semantics<parallel>], iteration_bounds = array<i64: 1>, scalar_prefetch = 0 : i64, scratch_operands = 0 : i64, tpu.core_type = #tpu.core_type<tc>, window_params = [{transform_indices = @transform_0, window_bounds = array<i64: 8, 16>}, {pipeline_mode = #tpu.pipeline_mode<synchronous>, transform_indices = @transform_1, window_bounds = array<i64: 16, 32>}, {pipeline_mode = #tpu.pipeline_mode<synchronous>, transform_indices = @transform_2, window_bounds = array<i64: 2, 32, 32>}, {pipeline_mode = #tpu.pipeline_mode<synchronous>, transform_indices = @transform_3, window_bounds = array<i64: 32, 64>}, {pipeline_mode = #tpu.pipeline_mode<synchronous>, transform_indices = @transform_4, window_bounds = array<i64: 2, 32, 32>}, {pipeline_mode = #tpu.pipeline_mode<synchronous>, transform_indices = @transform_5, window_bounds = array<i64: 2, 32, 128>}, {pipeline_mode = #tpu.pipeline_mode<synchronous>, transform_indices = @transform_6, window_bounds = array<i64: 3, 1, 32>}, {pipeline_mode = #tpu.pipeline_mode<synchronous>, transform_indices = @transform_7, window_bounds = array<i64: 1, 64>}, {pipeline_mode = #tpu.pipeline_mode<synchronous>, transform_indices = @transform_8, window_bounds = array<i64: 2, 1, 32>}, {pipeline_mode = #tpu.pipeline_mode<synchronous>, transform_indices = @transform_9, window_bounds = array<i64: 2, 1, 128>}, {transform_indices = @transform_10, window_bounds = array<i64: 8, 256>}]} {
    %c0 = arith.constant 0 : index
    %c0_0 = arith.constant 0 : index
    %0 = vector.load %arg1[%c0, %c0_0] : memref<8x16xf32, #tpu.memory_space<vmem>>, vector<8x16xf32>
    %c0_1 = arith.constant 0 : index
    %c0_2 = arith.constant 0 : index
    %1 = vector.load %arg2[%c0_1, %c0_2] : memref<16x32xf32, #tpu.memory_space<vmem>>, vector<16x32xf32>
    %cst = arith.constant dense<0.000000e+00> : vector<8x32xf32>
    %2 = tpu.matmul %0, %1, %cst {dimension_numbers = #tpu.dot_dimension_numbers<[1], [0], [0], [1], [0, 0, 1, 1], [], []>} : vector<8x16xf32>, vector<16x32xf32>, vector<8x32xf32> -> vector<8x32xf32>
    %c0_3 = arith.constant 0 : index
    %c0_4 = arith.constant 0 : index
    %c0_5 = arith.constant 0 : index
    %3 = vector.load %arg7[%c0_3, %c0_4, %c0_5] : memref<3x1x32xf32, #tpu.memory_space<vmem>>, vector<1x1x32xf32>
    %4 = vector.shape_cast %3 : vector<1x1x32xf32> to vector<1x32xf32>
    %5 = vector.broadcast %4 : vector<1x32xf32> to vector<8x32xf32>
    %6 = arith.addf %2, %5 : vector<8x32xf32>
    %cst_6 = arith.constant 5.000000e-01 : f32
    %7 = vector.broadcast %cst_6 : f32 to vector<8x32xf32>
    %8 = arith.mulf %7, %6 : vector<8x32xf32>
    %cst_7 = arith.constant 0.707106769 : f32
    %9 = vector.broadcast %cst_7 : f32 to vector<8x32xf32>
    %10 = arith.mulf %6, %9 : vector<8x32xf32>
    %11 = math.erf %10 : vector<8x32xf32>
    %cst_8 = arith.constant 1.000000e+00 : f32
    %12 = vector.broadcast %cst_8 : f32 to vector<8x32xf32>
    %13 = arith.addf %12, %11 : vector<8x32xf32>
    %14 = arith.mulf %8, %13 : vector<8x32xf32>
    %c0_9 = arith.constant 0 : index
    %c0_10 = arith.constant 0 : index
    %c0_11 = arith.constant 0 : index
    %15 = vector.load %arg3[%c0_9, %c0_10, %c0_11] : memref<2x32x32xf32, #tpu.memory_space<vmem>>, vector<1x32x32xf32>
    %16 = vector.shape_cast %15 : vector<1x32x32xf32> to vector<32x32xf32>
    %cst_12 = arith.constant dense<0.000000e+00> : vector<8x32xf32>
    %17 = tpu.matmul %14, %16, %cst_12 {dimension_numbers = #tpu.dot_dimension_numbers<[1], [0], [0], [1], [0, 0, 1, 1], [], []>} : vector<8x32xf32>, vector<32x32xf32>, vector<8x32xf32> -> vector<8x32xf32>
    %c1 = arith.constant 1 : index
    %c0_13 = arith.constant 0 : index
    %c0_14 = arith.constant 0 : index
    %18 = vector.load %arg7[%c1, %c0_13, %c0_14] : memref<3x1x32xf32, #tpu.memory_space<vmem>>, vector<1x1x32xf32>
    %19 = vector.shape_cast %18 : vector<1x1x32xf32> to vector<1x32xf32>
    %20 = vector.broadcast %19 : vector<1x32xf32> to vector<8x32xf32>
    %21 = arith.addf %17, %20 : vector<8x32xf32>
    %cst_15 = arith.constant 5.000000e-01 : f32
    %22 = vector.broadcast %cst_15 : f32 to vector<8x32xf32>
    %23 = arith.mulf %22, %21 : vector<8x32xf32>
    %cst_16 = arith.constant 0.707106769 : f32
    %24 = vector.broadcast %cst_16 : f32 to vector<8x32xf32>
    %25 = arith.mulf %21, %24 : vector<8x32xf32>
    %26 = math.erf %25 : vector<8x32xf32>
    %cst_17 = arith.constant 1.000000e+00 : f32
    %27 = vector.broadcast %cst_17 : f32 to vector<8x32xf32>
    %28 = arith.addf %27, %26 : vector<8x32xf32>
    %29 = arith.mulf %23, %28 : vector<8x32xf32>
    %c1_18 = arith.constant 1 : index
    %c0_19 = arith.constant 0 : index
    %c0_20 = arith.constant 0 : index
    %30 = vector.load %arg3[%c1_18, %c0_19, %c0_20] : memref<2x32x32xf32, #tpu.memory_space<vmem>>, vector<1x32x32xf32>
    %31 = vector.shape_cast %30 : vector<1x32x32xf32> to vector<32x32xf32>
    %cst_21 = arith.constant dense<0.000000e+00> : vector<8x32xf32>
    %32 = tpu.matmul %29, %31, %cst_21 {dimension_numbers = #tpu.dot_dimension_numbers<[1], [0], [0], [1], [0, 0, 1, 1], [], []>} : vector<8x32xf32>, vector<32x32xf32>, vector<8x32xf32> -> vector<8x32xf32>
    %c2 = arith.constant 2 : index
    %c0_22 = arith.constant 0 : index
    %c0_23 = arith.constant 0 : index
    %33 = vector.load %arg7[%c2, %c0_22, %c0_23] : memref<3x1x32xf32, #tpu.memory_space<vmem>>, vector<1x1x32xf32>
    %34 = vector.shape_cast %33 : vector<1x1x32xf32> to vector<1x32xf32>
    %35 = vector.broadcast %34 : vector<1x32xf32> to vector<8x32xf32>
    %36 = arith.addf %32, %35 : vector<8x32xf32>
    %cst_24 = arith.constant 5.000000e-01 : f32
    %37 = vector.broadcast %cst_24 : f32 to vector<8x32xf32>
    %38 = arith.mulf %37, %36 : vector<8x32xf32>
    %cst_25 = arith.constant 0.707106769 : f32
    %39 = vector.broadcast %cst_25 : f32 to vector<8x32xf32>
    %40 = arith.mulf %36, %39 : vector<8x32xf32>
    %41 = math.erf %40 : vector<8x32xf32>
    %cst_26 = arith.constant 1.000000e+00 : f32
    %42 = vector.broadcast %cst_26 : f32 to vector<8x32xf32>
    %43 = arith.addf %42, %41 : vector<8x32xf32>
    %44 = arith.mulf %38, %43 : vector<8x32xf32>
    %c0_27 = arith.constant 0 : index
    %c0_28 = arith.constant 0 : index
    %45 = vector.load %arg4[%c0_27, %c0_28] : memref<32x64xf32, #tpu.memory_space<vmem>>, vector<32x64xf32>
    %cst_29 = arith.constant dense<0.000000e+00> : vector<8x64xf32>
    %46 = tpu.matmul %44, %45, %cst_29 {dimension_numbers = #tpu.dot_dimension_numbers<[1], [0], [0], [1], [0, 0, 1, 1], [], []>} : vector<8x32xf32>, vector<32x64xf32>, vector<8x64xf32> -> vector<8x64xf32>
    %c0_30 = arith.constant 0 : index
    %c0_31 = arith.constant 0 : index
    %47 = vector.load %arg8[%c0_30, %c0_31] : memref<1x64xf32, #tpu.memory_space<vmem>>, vector<1x64xf32>
    %48 = vector.broadcast %47 : vector<1x64xf32> to vector<8x64xf32>
    %49 = arith.addf %46, %48 : vector<8x64xf32>
    %cst_32 = arith.constant 5.000000e-01 : f32
    %50 = vector.broadcast %cst_32 : f32 to vector<8x64xf32>
    %51 = arith.mulf %50, %49 : vector<8x64xf32>
    %cst_33 = arith.constant 0.707106769 : f32
    %52 = vector.broadcast %cst_33 : f32 to vector<8x64xf32>
    %53 = arith.mulf %49, %52 : vector<8x64xf32>
    %54 = math.erf %53 : vector<8x64xf32>
    %cst_34 = arith.constant 1.000000e+00 : f32
    %55 = vector.broadcast %cst_34 : f32 to vector<8x64xf32>
    %56 = arith.addf %55, %54 : vector<8x64xf32>
    %57 = arith.mulf %51, %56 : vector<8x64xf32>
    %58 = vector.extract_strided_slice %57 {offsets = [0, 0], sizes = [8, 32], strides = [1, 1]} : vector<8x64xf32> to vector<8x32xf32>
    %c0_35 = arith.constant 0 : index
    %c0_36 = arith.constant 0 : index
    %c0_37 = arith.constant 0 : index
    %59 = vector.load %arg5[%c0_35, %c0_36, %c0_37] : memref<2x32x32xf32, #tpu.memory_space<vmem>>, vector<1x32x32xf32>
    %60 = vector.shape_cast %59 : vector<1x32x32xf32> to vector<32x32xf32>
    %cst_38 = arith.constant dense<0.000000e+00> : vector<8x32xf32>
    %61 = tpu.matmul %58, %60, %cst_38 {dimension_numbers = #tpu.dot_dimension_numbers<[1], [0], [0], [1], [0, 0, 1, 1], [], []>} : vector<8x32xf32>, vector<32x32xf32>, vector<8x32xf32> -> vector<8x32xf32>
    %c0_39 = arith.constant 0 : index
    %c0_40 = arith.constant 0 : index
    %c0_41 = arith.constant 0 : index
    %62 = vector.load %arg9[%c0_39, %c0_40, %c0_41] : memref<2x1x32xf32, #tpu.memory_space<vmem>>, vector<1x1x32xf32>
    %63 = vector.shape_cast %62 : vector<1x1x32xf32> to vector<1x32xf32>
    %64 = vector.broadcast %63 : vector<1x32xf32> to vector<8x32xf32>
    %65 = arith.addf %61, %64 : vector<8x32xf32>
    %cst_42 = arith.constant 5.000000e-01 : f32
    %66 = vector.broadcast %cst_42 : f32 to vector<8x32xf32>
    %67 = arith.mulf %66, %65 : vector<8x32xf32>
    %cst_43 = arith.constant 0.707106769 : f32
    %68 = vector.broadcast %cst_43 : f32 to vector<8x32xf32>
    %69 = arith.mulf %65, %68 : vector<8x32xf32>
    %70 = math.erf %69 : vector<8x32xf32>
    %cst_44 = arith.constant 1.000000e+00 : f32
    %71 = vector.broadcast %cst_44 : f32 to vector<8x32xf32>
    %72 = arith.addf %71, %70 : vector<8x32xf32>
    %73 = arith.mulf %67, %72 : vector<8x32xf32>
    %74 = vector.extract_strided_slice %57 {offsets = [0, 32], sizes = [8, 32], strides = [1, 1]} : vector<8x64xf32> to vector<8x32xf32>
    %c1_45 = arith.constant 1 : index
    %c0_46 = arith.constant 0 : index
    %c0_47 = arith.constant 0 : index
    %75 = vector.load %arg5[%c1_45, %c0_46, %c0_47] : memref<2x32x32xf32, #tpu.memory_space<vmem>>, vector<1x32x32xf32>
    %76 = vector.shape_cast %75 : vector<1x32x32xf32> to vector<32x32xf32>
    %cst_48 = arith.constant dense<0.000000e+00> : vector<8x32xf32>
    %77 = tpu.matmul %74, %76, %cst_48 {dimension_numbers = #tpu.dot_dimension_numbers<[1], [0], [0], [1], [0, 0, 1, 1], [], []>} : vector<8x32xf32>, vector<32x32xf32>, vector<8x32xf32> -> vector<8x32xf32>
    %c1_49 = arith.constant 1 : index
    %c0_50 = arith.constant 0 : index
    %c0_51 = arith.constant 0 : index
    %78 = vector.load %arg9[%c1_49, %c0_50, %c0_51] : memref<2x1x32xf32, #tpu.memory_space<vmem>>, vector<1x1x32xf32>
    %79 = vector.shape_cast %78 : vector<1x1x32xf32> to vector<1x32xf32>
    %80 = vector.broadcast %79 : vector<1x32xf32> to vector<8x32xf32>
    %81 = arith.addf %77, %80 : vector<8x32xf32>
    %cst_52 = arith.constant 5.000000e-01 : f32
    %82 = vector.broadcast %cst_52 : f32 to vector<8x32xf32>
    %83 = arith.mulf %82, %81 : vector<8x32xf32>
    %cst_53 = arith.constant 0.707106769 : f32
    %84 = vector.broadcast %cst_53 : f32 to vector<8x32xf32>
    %85 = arith.mulf %81, %84 : vector<8x32xf32>
    %86 = math.erf %85 : vector<8x32xf32>
    %cst_54 = arith.constant 1.000000e+00 : f32
    %87 = vector.broadcast %cst_54 : f32 to vector<8x32xf32>
    %88 = arith.addf %87, %86 : vector<8x32xf32>
    %89 = arith.mulf %83, %88 : vector<8x32xf32>
    %c0_55 = arith.constant 0 : index
    %c0_56 = arith.constant 0 : index
    %c0_57 = arith.constant 0 : index
    %90 = vector.load %arg6[%c0_55, %c0_56, %c0_57] : memref<2x32x128xf32, #tpu.memory_space<vmem>>, vector<1x32x128xf32>
    %91 = vector.shape_cast %90 : vector<1x32x128xf32> to vector<32x128xf32>
    %cst_58 = arith.constant dense<0.000000e+00> : vector<8x128xf32>
    %92 = tpu.matmul %73, %91, %cst_58 {dimension_numbers = #tpu.dot_dimension_numbers<[1], [0], [0], [1], [0, 0, 1, 1], [], []>} : vector<8x32xf32>, vector<32x128xf32>, vector<8x128xf32> -> vector<8x128xf32>
    %c0_59 = arith.constant 0 : index
    %c0_60 = arith.constant 0 : index
    %c0_61 = arith.constant 0 : index
    %93 = vector.load %arg10[%c0_59, %c0_60, %c0_61] : memref<2x1x128xf32, #tpu.memory_space<vmem>>, vector<1x1x128xf32>
    %94 = vector.shape_cast %93 : vector<1x1x128xf32> to vector<1x128xf32>
    %95 = vector.broadcast %94 : vector<1x128xf32> to vector<8x128xf32>
    %96 = arith.addf %92, %95 : vector<8x128xf32>
    %c1_62 = arith.constant 1 : index
    %c0_63 = arith.constant 0 : index
    %c0_64 = arith.constant 0 : index
    %97 = vector.load %arg6[%c1_62, %c0_63, %c0_64] : memref<2x32x128xf32, #tpu.memory_space<vmem>>, vector<1x32x128xf32>
    %98 = vector.shape_cast %97 : vector<1x32x128xf32> to vector<32x128xf32>
    %cst_65 = arith.constant dense<0.000000e+00> : vector<8x128xf32>
    %99 = tpu.matmul %89, %98, %cst_65 {dimension_numbers = #tpu.dot_dimension_numbers<[1], [0], [0], [1], [0, 0, 1, 1], [], []>} : vector<8x32xf32>, vector<32x128xf32>, vector<8x128xf32> -> vector<8x128xf32>
    %c1_66 = arith.constant 1 : index
    %c0_67 = arith.constant 0 : index
    %c0_68 = arith.constant 0 : index
    %100 = vector.load %arg10[%c1_66, %c0_67, %c0_68] : memref<2x1x128xf32, #tpu.memory_space<vmem>>, vector<1x1x128xf32>
    %101 = vector.shape_cast %100 : vector<1x1x128xf32> to vector<1x128xf32>
    %102 = vector.broadcast %101 : vector<1x128xf32> to vector<8x128xf32>
    %103 = arith.addf %99, %102 : vector<8x128xf32>
    %cst_69 = arith.constant 2.000000e-01 : f32
    %104 = vector.broadcast %cst_69 : f32 to vector<8x128xf32>
    %105 = arith.mulf %103, %104 : vector<8x128xf32>
    %106 = math.tanh %105 : vector<8x128xf32>
    %cst_70 = arith.constant 1.000000e+00 : f32
    %107 = vector.broadcast %cst_70 : f32 to vector<8x128xf32>
    %108 = arith.mulf %107, %106 : vector<8x128xf32>
    %cst_71 = arith.constant 0.000000e+00 : f32
    %109 = vector.broadcast %cst_71 : f32 to vector<8x128xf32>
    %110 = arith.maximumf %108, %109 : vector<8x128xf32>
    %cst_72 = arith.constant 5.000000e+00 : f32
    %111 = vector.broadcast %cst_72 : f32 to vector<8x128xf32>
    %112 = arith.mulf %111, %106 : vector<8x128xf32>
    %cst_73 = arith.constant 0.000000e+00 : f32
    %113 = vector.broadcast %cst_73 : f32 to vector<8x128xf32>
    %114 = arith.minimumf %112, %113 : vector<8x128xf32>
    %115 = arith.addf %110, %114 : vector<8x128xf32>
    %c0_74 = arith.constant 0 : index
    %c0_75 = arith.constant 0 : index
    %116 = vector.load %arg11[%c0_74, %c0_75] : memref<8x256xf32, #tpu.memory_space<vmem>>, vector<8x128xf32>
    tpu.vector_store %arg11[%c0_74, %c0_75], %96 {strides = array<i32>} : memref<8x256xf32, #tpu.memory_space<vmem>>, vector<8x128xf32>,
    %c0_76 = arith.constant 0 : index
    %c128 = arith.constant 128 : index
    %117 = vector.load %arg11[%c0_76, %c128] : memref<8x256xf32, #tpu.memory_space<vmem>>, vector<8x128xf32>
    tpu.vector_store %arg11[%c0_76, %c128], %115 {strides = array<i32>} : memref<8x256xf32, #tpu.memory_space<vmem>>, vector<8x128xf32>,
    return
  }
  func.func @transform_0(%arg0: i32) -> (i32, i32) {
    %c0_i32 = arith.constant 0 : i32
    %c0_i32_0 = arith.constant 0 : i32
    return %arg0, %c0_i32 : i32, i32
  }
  func.func @transform_1(%arg0: i32) -> (i32, i32) {
    %c0_i32 = arith.constant 0 : i32
    %c0_i32_0 = arith.constant 0 : i32
    %c0_i32_1 = arith.constant 0 : i32
    return %c0_i32, %c0_i32_0 : i32, i32
  }
  func.func @transform_2(%arg0: i32) -> (i32, i32, i32) {
    %c0_i32 = arith.constant 0 : i32
    %c0_i32_0 = arith.constant 0 : i32
    %c0_i32_1 = arith.constant 0 : i32
    %c0_i32_2 = arith.constant 0 : i32
    return %c0_i32, %c0_i32_0, %c0_i32_1 : i32, i32, i32
  }
  func.func @transform_3(%arg0: i32) -> (i32, i32) {
    %c0_i32 = arith.constant 0 : i32
    %c0_i32_0 = arith.constant 0 : i32
    %c0_i32_1 = arith.constant 0 : i32
    return %c0_i32, %c0_i32_0 : i32, i32
  }
  func.func @transform_4(%arg0: i32) -> (i32, i32, i32) {
    %c0_i32 = arith.constant 0 : i32
    %c0_i32_0 = arith.constant 0 : i32
    %c0_i32_1 = arith.constant 0 : i32
    %c0_i32_2 = arith.constant 0 : i32
    return %c0_i32, %c0_i32_0, %c0_i32_1 : i32, i32, i32
  }
  func.func @transform_5(%arg0: i32) -> (i32, i32, i32) {
    %c0_i32 = arith.constant 0 : i32
    %c0_i32_0 = arith.constant 0 : i32
    %c0_i32_1 = arith.constant 0 : i32
    %c0_i32_2 = arith.constant 0 : i32
    return %c0_i32, %c0_i32_0, %c0_i32_1 : i32, i32, i32
  }
  func.func @transform_6(%arg0: i32) -> (i32, i32, i32) {
    %c0_i32 = arith.constant 0 : i32
    %c0_i32_0 = arith.constant 0 : i32
    %c0_i32_1 = arith.constant 0 : i32
    %c0_i32_2 = arith.constant 0 : i32
    return %c0_i32, %c0_i32_0, %c0_i32_1 : i32, i32, i32
  }
  func.func @transform_7(%arg0: i32) -> (i32, i32) {
    %c0_i32 = arith.constant 0 : i32
    %c0_i32_0 = arith.constant 0 : i32
    %c0_i32_1 = arith.constant 0 : i32
    return %c0_i32, %c0_i32_0 : i32, i32
  }
  func.func @transform_8(%arg0: i32) -> (i32, i32, i32) {
    %c0_i32 = arith.constant 0 : i32
    %c0_i32_0 = arith.constant 0 : i32
    %c0_i32_1 = arith.constant 0 : i32
    %c0_i32_2 = arith.constant 0 : i32
    return %c0_i32, %c0_i32_0, %c0_i32_1 : i32, i32, i32
  }
  func.func @transform_9(%arg0: i32) -> (i32, i32, i32) {
    %c0_i32 = arith.constant 0 : i32
    %c0_i32_0 = arith.constant 0 : i32
    %c0_i32_1 = arith.constant 0 : i32
    %c0_i32_2 = arith.constant 0 : i32
    return %c0_i32, %c0_i32_0, %c0_i32_1 : i32, i32, i32
  }
  func.func @transform_10(%arg0: i32) -> (i32, i32) {
    %c0_i32 = arith.constant 0 : i32
    %c0_i32_0 = arith.constant 0 : i32
    return %arg0, %c0_i32 : i32, i32
  }
}

</mosaic_0001>

<bundles_post_ra>
// kernel: actor_forward.1
= control target key start
LH: loop header
LB: loop body
LE: loop exit
PB: predicated region body
PF: predicated region fallthrough
CT: control target
= control target key end

     0   :  { %15 = vsyncpa [#allocation3], 0  ;;  %s1319_s0 = inlined_call_operand.hbm [shape: f32[8,16], index: 0, kind: input, shape index: {}]   ;;  %s1320_s1 = inlined_call_operand.hbm [shape: f32[16,32], index: 1, kind: input, shape index: {}]   ;;  %s1321_s2 = inlined_call_operand.hbm [shape: f32[2,32,32], index: 2, kind: input, shape index: {}]   ;;  %s1322_s3 = inlined_call_operand.hbm [shape: f32[32,64], index: 3, kind: input, shape index: {}]   ;;  %s1323_s4 = inlined_call_operand.hbm [shape: f32[2,32,32], index: 4, kind: input, shape index: {}]   ;;  %s1324_s5 = inlined_call_operand.hbm [shape: f32[2,32,128], index: 5, kind: input, shape index: {}]   ;;  %s1325_s6 = inlined_call_operand.vmem [shape: f32[3,1,32], index: 6, kind: input, shape index: {}]   ;;  %s1326_s7 = inlined_call_operand.vmem [shape: f32[1,64], index: 7, kind: input, shape index: {}]   ;;  %s1327_s8 = inlined_call_operand.vmem [shape: f32[2,1,32], index: 8, kind: input, shape index: {}]   ;;  %s1328_s9 = inlined_call_operand.vmem [shape: f32[2,1,128], index: 9, kind: input, shape index: {}]   ;;  %s1329_s10 = inlined_call_operand.vmem [shape: f32[8,256], index: 10, kind: output, shape index: {}]  }
   0x1   :  { %16 = vsyncpa [#allocation5], 0 }
   0x2   :  { %17 = vsyncpa [#allocation8], 0 }
   0x3   :  { %18 = vsyncpa [#allocation11], 0  ;;  %s1137_s13 = smov [#allocation4]  }
   0x4   :  { %s34_s14 = sshll.u32 %s1137_s13, 4  ;;  %s35_s14 = int_to_ptr.vmem [resolvable:$true] %s34_s14 }
   0x5   :  { %s1017_s15 = scalar_lea.vmem %s35_s14, 256  ;;  %p1022_p1 = scmp.lt.s32.totalorder %s35_s14, %s35_s14 }
   0x6   :  { %p1018_p0 = scmp.ne.s32.totalorder %s35_s14, %s1017_s15  ;;  %p1023_p2 = scmp.lt.s32.totalorder %s1017_s15, %s1017_s15 }
   0x8   :  { %p1024_p3 = por %p1023_p2, %p1022_p1 }
   0xa   :  { %p1025_p4 = pnand %p1024_p3, %p1018_p0 }
   0xc   :  { %1028 = shalt.err (!%p1025_p4)
}
   0xd   :  { %s1138_s16 = smov 128   ;;  %s1139_s17 = smov 8  }
   0xe   :  { %40 = dma.hbm_to_vmem [thread:$0]  %s1320_s1, 256, %s35_s14, [#allocation5], %s1138_s16, %s1138_s16, %s1139_s17  }
   0xf   :  { %s1140_s20 = smov [#allocation7]   ;;  %s1141_s22 = smov [#allocation2]  }
  0x10   :  { %s58_s21 = sshll.u32 %s1140_s20, 4  ;;  %s25_s23 = sshll.u32 %s1141_s22, 4  ;;  %s59_s21 = int_to_ptr.vmem [resolvable:$true] %s58_s21  ;;  %s26_s23 = int_to_ptr.vmem [resolvable:$true] %s25_s23 }
  0x11   :  { %s1037_s24 = scalar_lea.vmem %s59_s21, 512  ;;  %p1042_p6 = scmp.lt.s32.totalorder %s59_s21, %s59_s21 }
  0x12   :  { %p1038_p5 = scmp.ne.s32.totalorder %s59_s21, %s1037_s24  ;;  %p1043_p7 = scmp.lt.s32.totalorder %s1037_s24, %s1037_s24 }
  0x14   :  { %p1044_p8 = por %p1043_p7, %p1042_p6 }
  0x16   :  { %p1045_p9 = pnand %p1044_p8, %p1038_p5 }
  0x18   :  { %1048 = shalt.err (!%p1045_p9)
}
  0x19   :  { %64 = dma.hbm_to_vmem [thread:$0]  %s1322_s3, 512, %s59_s21, [#allocation8], %s1138_s16, %s1138_s16, %s1139_s17  }
  0x1a   :  { %s1057_s1 = scalar_lea.vmem %s26_s23, 128  ;;  %p1062_p11 = scmp.lt.s32.totalorder %s26_s23, %s26_s23 }
  0x1b   :  { %p1058_p10 = scmp.ne.s32.totalorder %s26_s23, %s1057_s1  ;;  %p1063_p12 = scmp.lt.s32.totalorder %s1057_s1, %s1057_s1 }
  0x1d   :  { %p1064_p13 = por %p1063_p12, %p1062_p11 }
  0x1f   :  { %p1065_p0 = pnand %p1064_p13, %p1058_p10 }
  0x21   :  { %1068 = shalt.err (!%p1065_p0)
}
  0x22   :  { %28 = dma.hbm_to_vmem [thread:$0]  %s1319_s0, 128, %s26_s23, [#allocation3]  }
  0x23   :  { %s1142_s29 = smov [#allocation6]   ;;  %s1143_s11 = smov [#allocation9]  }
  0x24   :  { %s46_s30 = sshll.u32 %s1142_s29, 4  ;;  %s70_s12 = sshll.u32 %s1143_s11, 4  ;;  %s47_s30 = int_to_ptr.vmem [resolvable:$true] %s46_s30  ;;  %s71_s12 = int_to_ptr.vmem [resolvable:$true] %s70_s12 }
  0x25   :  { %s1077_s13 = scalar_lea.vmem %s47_s30, 1024  ;;  %p1082_p2 = scmp.lt.s32.totalorder %s47_s30, %s47_s30 }
  0x26   :  { %p1078_p1 = scmp.ne.s32.totalorder %s47_s30, %s1077_s13  ;;  %p1083_p3 = scmp.lt.s32.totalorder %s1077_s13, %s1077_s13 }
  0x28   :  { %p1084_p4 = por %p1083_p3, %p1082_p2 }
  0x2a   :  { %p1085_p5 = pnand %p1084_p4, %p1078_p1 }
  0x2c   :  { %1088 = shalt.err (!%p1085_p5)
}
  0x2d   :  { %52 = dma.hbm_to_vmem [thread:$0]  %s1321_s2, 1024, %s47_s30, [#allocation5], %s1138_s16, %s1138_s16, %s1139_s17  }
  0x2e   :  { %s1097_s0 = scalar_lea.vmem %s71_s12, 1024  ;;  %p1102_p7 = scmp.lt.s32.totalorder %s71_s12, %s71_s12 }
  0x2f   :  { %p1098_p6 = scmp.ne.s32.totalorder %s71_s12, %s1097_s0  ;;  %p1103_p8 = scmp.lt.s32.totalorder %s1097_s0, %s1097_s0 }
  0x31   :  { %p1104_p9 = por %p1103_p8, %p1102_p7 }
  0x33   :  { %p1105_p10 = pnand %p1104_p9, %p1098_p6 }
  0x35   :  { %1108 = shalt.err (!%p1105_p10)
}
  0x36   :  { %76 = dma.hbm_to_vmem [thread:$0]  %s1323_s4, 1024, %s71_s12, [#allocation8], %s1138_s16, %s1138_s16, %s1139_s17  }
  0x37   :  { %s1144_s19 = smov [#allocation10]  }
  0x38   :  { %s82_s20 = sshll.u32 %s1144_s19, 4  ;;  %s83_s20 = int_to_ptr.vmem [resolvable:$true] %s82_s20 }
  0x39   :  { %s1117_s21 = scalar_lea.vmem %s83_s20, 1024  ;;  %p1122_p12 = scmp.lt.s32.totalorder %s83_s20, %s83_s20 }
  0x3a   :  { %p1118_p11 = scmp.ne.s32.totalorder %s83_s20, %s1117_s21  ;;  %p1123_p13 = scmp.lt.s32.totalorder %s1117_s21, %s1117_s21 }
  0x3c   :  { %p1124_p0 = por %p1123_p13, %p1122_p12 }
  0x3e   :  { %p1125_p1 = pnand %p1124_p0, %p1118_p11 }
  0x40   :  { %1128 = shalt.err (!%p1125_p1)
}
  0x41   :  { %88 = dma.hbm_to_vmem [thread:$0]  %s1324_s5, 1024, %s83_s20, [#allocation11], %s1138_s16, %s1138_s16, %s1139_s17  }
  0x42   :  { %1129 = dma.done.wait [#allocation3], 128  }
  0x43   :  { %1130 = vsyncadd [#allocation3], 4294967168 }
  0x44   :  { %1131 = dma.done.wait [#allocation5], 1280  }
  0x45   :  { %1132 = vsyncadd [#allocation5], 4294966016 }
  0x46   :  { %1133 = dma.done.wait [#allocation8], 1536  }
  0x47   :  { %1134 = vsyncadd [#allocation8], 4294965760 }
  0x48   :  { %1135 = dma.done.wait [#allocation11], 1024  }
  0x49   :  { %1136 = vsyncadd [#allocation11], 4294966272  ;;  %v1145_v0 = vmov 0.0   ;;  %vm1146_vm0 = vmmov 0   ;;  %v117_v1 = vld [vmem:[#allocation4 + $0x8] sm:$0xff]  ;;  %v116_v2 = vld [vmem:[#allocation4] sm:$0xff] }
  0x4a   :  { %900 = vmatprep.subr.mxu0 %v1145_v0  ;;  %904 = vmatprep.mubr.msk.f32.mxu0 %vm1146_vm0, %v1145_v0  ;;  %v115_v3 = vld [vmem:[#allocation2] sm:$0xff]  ;;  %vm125_vm1 = vcmask 130048   ;;  %v207_v4 = vld [vmem:[#allocation6 + $0x18] sm:$0xff]  ;;  %v206_v5 = vld [vmem:[#allocation6 + $0x10] sm:$0xff]  ;;  %vm216_vm2 = vcmask 261120   ;;  %s1147_s26 = smov 96  }
  0x4b   :  { %907 = vmatprep.subr.mxu1 %v1145_v0  ;;  %915 = vmatprep.mubr.msk.f32.mxu1 %vm1146_vm0, %v1145_v0  ;;  %v205_v6 = vld [vmem:[#allocation6 + $0x8] sm:$0xff]  ;;  %v204_v7 = vld [vmem:[#allocation6] sm:$0xff]  ;;  %v299_v17 = vld [vmem:[#allocation6 + $0x38] sm:$0xff] }
  0x4c   :  { %901 = vmatpush3.msra.mxu0 %v117_v1  ;;  %908 = vmatpush3.msra.mxu1 %v207_v4  ;;  %v842_v8 = vld [vmem:[%s1325_s6] ss:$0 sm:$0xff]  ;;  %v298_v18 = vld [vmem:[#allocation6 + $0x30] sm:$0xff]  ;;  %v296_v20 = vld [vmem:[#allocation6 + $0x20] sm:$0xff] }
  0x4d   :  { %902 = vmatprep.subr.mxu0 %v1145_v0  ;;  %909 = vmatprep.subr.mxu1 %v1145_v0  ;;  %v297_v19 = vld [vmem:[#allocation6 + $0x28] sm:$0xff]  ;;  %v389_v30 = vld [vmem:[#allocation7 + $0x18] sm:$0xff]  ;;  %v388_v31 = vld [vmem:[#allocation7 + $0x10] sm:$0xff] }
  0x4e   :  { %903 = vmatpush3.msra.mxu0 %v116_v2  ;;  %910 = vmatpush3.msra.mxu1 %v206_v5  ;;  %v845_v21 = vld [vmem:[%s1325_s6 + $0x1] ss:$0 sm:$0xff]  ;;  %v386_v33 = vld [vmem:[#allocation7] sm:$0xff]  ;;  %v848_v34 = vld [vmem:[%s1325_s6 + $0x2] ss:$0 sm:$0xff] }
  0x4f   :  { %905 = vmatmul.mubr.msk.f32.vlgmr.msra.gmra.mxu0 %vm125_vm1, %v115_v3  ;;  %918 = vmatprep.subr.mxu0 %v1145_v0  ;;  %v387_v32 = vld [vmem:[#allocation7 + $0x8] sm:$0xff]  ;;  %v478_v43 = vld [vmem:[#allocation9 + $0x18] sm:$0xff]  ;;  %v477_v44 = vld [vmem:[#allocation9 + $0x10] sm:$0xff] }
  0x50   :  { %926 = vmatprep.mubr.msk.f32.mxu0 %vm1146_vm0, %v1145_v0  ;;  %911 = vmatprep.subr.mxu1 %v1145_v0  ;;  %v476_v45 = vld [vmem:[#allocation9 + $0x8] sm:$0xff]  ;;  %v475_v46 = vld [vmem:[#allocation9] sm:$0xff]  ;;  %v568_v47 = vld [vmem:[#allocation9 + $0x38] sm:$0xff] }
  0x51   :  { %912 = vmatpush3.msra.mxu1 %v205_v6  ;;  %919 = vmatpush3.msra.mxu0 %v299_v17  ;;  %v567_v48 = vld [vmem:[#allocation9 + $0x30] sm:$0xff]  ;;  %v566_v49 = vld [vmem:[#allocation9 + $0x28] sm:$0xff]  ;;  %v565_v55 = vld [vmem:[#allocation9 + $0x20] sm:$0xff] }
  0x52   :  { %913 = vmatprep.subr.mxu1 %v1145_v0  ;;  %920 = vmatprep.subr.mxu0 %v1145_v0  ;;  %v850_v50 = vld [vmem:[%s1326_s7] ss:$0 sm:$0xff]  ;;  %v659_v60 = vld [vmem:[#allocation10 + $0x18] sm:$0xff]  ;;  %v658_v61 = vld [vmem:[#allocation10 + $0x10] sm:$0xff] }
  0x53   :  { %914 = vmatpush3.msra.mxu1 %v204_v7  ;;  %921 = vmatpush3.msra.mxu0 %v298_v18  ;;  %v657_v62 = vld [vmem:[#allocation10 + $0x8] sm:$0xff]  ;;  %v656_v63 = vld [vmem:[#allocation10] sm:$0xff]  ;;  %v744_v6 = vld [vmem:[#allocation10 + $0x38] sm:$0xff] }
  0x54   :  { %929 = vmatprep.subr.mxu1 %v1145_v0  ;;  %922 = vmatprep.subr.mxu0 %v1145_v0  ;;  %v852_v2 = vld [vmem:[%s1327_s8] ss:$0 sm:$0xff] }
  0x55   :  { %923 = vmatpush3.msra.mxu0 %v297_v19 }
  0x56   :  { %924 = vmatprep.subr.mxu0 %v1145_v0 }
  0x57   :  { %925 = vmatpush3.msra.mxu0 %v296_v20 }
  0x58   :  { %940 = vmatprep.subr.mxu0 %v1145_v0 }
 0x10f   :  { %v195_v9 = vpop.f32.mrf.mxu0 }
 0x110   :  { %v196_v10 = vadd.f32 %v842_v8, %v195_v9  ;;  %v743_v8 = vld [vmem:[#allocation10 + $0x30] sm:$0xff]  ;;  %v742_v9 = vld [vmem:[#allocation10 + $0x28] sm:$0xff] }
 0x111   :  { %v906_v11 = vpop.f32.mrf.mxu0 }
 0x112   :  { %v200_v12 = vmul.f32 0.70710677, %v196_v10  ;;  %v199_v14 = vmul.f32 0.5, %v196_v10  ;;  %v741_v10 = vld [vmem:[#allocation10 + $0x20] sm:$0xff] }
 0x114   :  { %995 = verf.f32 %v200_v12 }
 0x121   :  { %v996_v13 = vpop.eup %995 }
 0x122   :  { %v202_v15 = vadd.f32 1.0, %v996_v13 }
 0x124   :  { %v203_v16 = vmul.f32 %v202_v15, %v199_v14  ;;  %v855_v15 = vld [vmem:[%s1327_s8 + $0x1] ss:$0 sm:$0xff] }
 0x126   :  { %916 = vmatmul.mubr.msk.f32.vlgmr.msra.gmra.mxu1 %vm216_vm2, %v203_v16 }
 0x127   :  { %937 = vmatprep.mubr.msk.f32.mxu1 %vm1146_vm0, %v1145_v0  ;;  %930 = vmatpush3.msra.mxu1 %v389_v30 }
 0x128   :  { %931 = vmatprep.subr.mxu1 %v1145_v0 }
 0x129   :  { %932 = vmatpush3.msra.mxu1 %v388_v31 }
 0x12a   :  { %933 = vmatprep.subr.mxu1 %v1145_v0 }
 0x12b   :  { %934 = vmatpush3.msra.mxu1 %v387_v32 }
 0x12c   :  { %935 = vmatprep.subr.mxu1 %v1145_v0 }
 0x12d   :  { %936 = vmatpush3.msra.mxu1 %v386_v33 }
 0x12e   :  { %951 = vmatprep.subr.mxu1 %v1145_v0 }
 0x1e6   :  { %v286_v22 = vpop.f32.mrf.mxu1 }
 0x1e7   :  { %v287_v23 = vadd.f32 %v845_v21, %v286_v22 }
 0x1e8   :  { %v917_v24 = vpop.f32.mrf.mxu1 }
 0x1e9   :  { %v291_v25 = vmul.f32 0.70710677, %v287_v23  ;;  %v290_v27 = vmul.f32 0.5, %v287_v23  ;;  %v857_v23 = vld [vmem:[%s1328_s9] ss:$0 sm:$0xff] }
 0x1eb   :  { %997 = verf.f32 %v291_v25 }
 0x1f8   :  { %v998_v26 = vpop.eup %997 }
 0x1f9   :  { %v293_v28 = vadd.f32 1.0, %v998_v26 }
 0x1fb   :  { %v294_v29 = vmul.f32 %v293_v28, %v290_v27  ;;  %v860_v27 = vld [vmem:[%s1328_s9 + $0x1] ss:$0 sm:$0xff] }
 0x1fd   :  { %927 = vmatmul.mubr.msk.f32.vlgmr.msra.gmra.mxu0 %vm216_vm2, %v294_v29 }
 0x1fe   :  { %948 = vmatprep.mubr.msk.f32.mxu0 %vm1146_vm0, %v1145_v0  ;;  %941 = vmatpush3.msra.mxu0 %v478_v43 }
 0x1ff   :  { %942 = vmatprep.subr.mxu0 %v1145_v0 }
 0x200   :  { %943 = vmatpush3.msra.mxu0 %v477_v44 }
 0x201   :  { %944 = vmatprep.subr.mxu0 %v1145_v0 }
 0x202   :  { %945 = vmatpush3.msra.mxu0 %v476_v45 }
 0x203   :  { %946 = vmatprep.subr.mxu0 %v1145_v0 }
 0x204   :  { %947 = vmatpush3.msra.mxu0 %v475_v46 }
 0x205   :  { %962 = vmatprep.subr.mxu0 %v1145_v0 }
 0x2bd   :  { %v377_v35 = vpop.f32.mrf.mxu0 }
 0x2be   :  { %v378_v36 = vadd.f32 %v848_v34, %v377_v35 }
 0x2bf   :  { %v928_v37 = vpop.f32.mrf.mxu0 }
 0x2c0   :  { %v382_v38 = vmul.f32 0.70710677, %v378_v36  ;;  %v381_v40 = vmul.f32 0.5, %v378_v36 }
 0x2c2   :  { %999 = verf.f32 %v382_v38 }
 0x2cf   :  { %v1000_v39 = vpop.eup %999 }
 0x2d0   :  { %v384_v41 = vadd.f32 1.0, %v1000_v39 }
 0x2d2   :  { %v385_v42 = vmul.f32 %v384_v41, %v381_v40 }
 0x2d4   :  { %938 = vmatmul.mubr.msk.f32.vlgmr.msra.gmra.mxu1 %vm216_vm2, %v385_v42 }
 0x2d5   :  { %959 = vmatprep.mubr.msk.f32.mxu1 %vm1146_vm0, %v1145_v0  ;;  %952 = vmatpush3.msra.mxu1 %v568_v47 }
 0x2d6   :  { %953 = vmatprep.subr.mxu1 %v1145_v0 }
 0x2d7   :  { %954 = vmatpush3.msra.mxu1 %v567_v48 }
 0x2d8   :  { %955 = vmatprep.subr.mxu1 %v1145_v0 }
 0x2d9   :  { %956 = vmatpush3.msra.mxu1 %v566_v49 }
 0x2da   :  { %957 = vmatprep.subr.mxu1 %v1145_v0 }
 0x2db   :  { %958 = vmatpush3.msra.mxu1 %v565_v55 }
 0x2dc   :  { %973 = vmatprep.subr.mxu1 %v1145_v0 }
 0x394   :  { %v466_v51 = vpop.f32.mrf.mxu1 }
 0x395   :  { %v467_v52 = vadd.f32 %v850_v50, %v466_v51 }
 0x396   :  { %v939_v53 = vpop.f32.mrf.mxu1 }
 0x397   :  { %v471_v54 = vmul.f32 0.70710677, %v467_v52  ;;  %v470_v57 = vmul.f32 0.5, %v467_v52 }
 0x399   :  { %1001 = verf.f32 %v471_v54 }
 0x3a6   :  { %v1002_v56 = vpop.eup %1001 }
 0x3a7   :  { %v473_v58 = vadd.f32 1.0, %v1002_v56 }
 0x3a9   :  { %v474_v59 = vmul.f32 %v473_v58, %v470_v57 }
 0x3ab   :  { %949 = vmatmul.mubr.msk.f32.vlgmr.msra.gmra.mxu0 %vm216_vm2, %v474_v59  ;;  %577 = vrot.lane.b32.xlu0 %v474_v59, %s1147_s26 }
 0x3ac   :  { %970 = vmatprep.mubr.msk.f32.mxu0 %vm1146_vm0, %v1145_v0  ;;  %963 = vmatpush3.msra.mxu0 %v659_v60 }
 0x3ad   :  { %964 = vmatprep.subr.mxu0 %v1145_v0 }
 0x3ae   :  { %965 = vmatpush3.msra.mxu0 %v658_v61 }
 0x3af   :  { %966 = vmatprep.subr.mxu0 %v1145_v0 }
 0x3b0   :  { %967 = vmatpush3.msra.mxu0 %v657_v62 }
 0x3b1   :  { %968 = vmatprep.subr.mxu0 %v1145_v0 }
 0x3b2   :  { %969 = vmatpush3.msra.mxu0 %v656_v63 }
 0x41d   :  { %v578_v1 = vpop.permute.xlu0 %577 }
 0x41e   :  { %960 = vmatmul.mubr.msk.f32.vlgmr.msra.gmra.mxu1 %vm216_vm2, %v578_v1 }
 0x41f   :  { %981 = vmatprep.mubr.msk.f32.mxu1 %vm1146_vm0, %v1145_v0  ;;  %974 = vmatpush3.msra.mxu1 %v744_v6 }
 0x420   :  { %975 = vmatprep.subr.mxu1 %v1145_v0 }
 0x421   :  { %976 = vmatpush3.msra.mxu1 %v743_v8 }
 0x422   :  { %977 = vmatprep.subr.mxu1 %v1145_v0 }
 0x423   :  { %978 = vmatpush3.msra.mxu1 %v742_v9 }
 0x424   :  { %979 = vmatprep.subr.mxu1 %v1145_v0 }
 0x425   :  { %980 = vmatpush3.msra.mxu1 %v741_v10 }
 0x46b   :  { %v555_v3 = vpop.f32.mrf.mxu0 }
 0x46c   :  { %v556_v4 = vadd.f32 %v852_v2, %v555_v3 }
 0x46d   :  { %v950_v5 = vpop.f32.mrf.mxu0 }
 0x46e   :  { %v560_v7 = vmul.f32 0.70710677, %v556_v4  ;;  %v559_v12 = vmul.f32 0.5, %v556_v4 }
 0x470   :  { %1003 = verf.f32 %v560_v7 }
 0x47d   :  { %v1004_v11 = vpop.eup %1003 }
 0x47e   :  { %v562_v13 = vadd.f32 1.0, %v1004_v11 }
 0x480   :  { %v563_v14 = vmul.f32 %v562_v13, %v559_v12 }
 0x482   :  { %971 = vmatmul.mubr.msk.f32.vlgmr.msra.gmra.mxu0 %vm216_vm2, %v563_v14 }
 0x4de   :  { %v647_v16 = vpop.f32.mrf.mxu1 }
 0x4df   :  { %v648_v17 = vadd.f32 %v855_v15, %v647_v16 }
 0x4e0   :  { %v961_v18 = vpop.f32.mrf.mxu1 }
 0x4e1   :  { %v652_v19 = vmul.f32 0.70710677, %v648_v17  ;;  %v651_v21 = vmul.f32 0.5, %v648_v17 }
 0x4e3   :  { %1005 = verf.f32 %v652_v19 }
 0x4f0   :  { %v1006_v20 = vpop.eup %1005 }
 0x4f1   :  { %v654_v0 = vadd.f32 1.0, %v1006_v20 }
 0x4f3   :  { %v655_v22 = vmul.f32 %v654_v0, %v651_v21 }
 0x4f5   :  { %982 = vmatmul.mubr.msk.f32.vlgmr.msra.gmra.mxu1 %vm216_vm2, %v655_v22 }
 0x542   :  { %v736_v24 = vpop.f32.mrf.mxu0 }
 0x543   :  { %v737_v25 = vadd.f32 %v857_v23, %v736_v24 }
 0x544   :  { %v972_v26 = vpop.f32.mrf.mxu0 }
 0x545   :  { %832 = vst [vmem:[%s1329_s10] sm:$0xff] %v737_v25 }
 0x5b5   :  { %v822_v28 = vpop.f32.mrf.mxu1 }
 0x5b6   :  { %v823_v29 = vadd.f32 %v860_v27, %v822_v28 }
 0x5b7   :  { %v983_v30 = vpop.f32.mrf.mxu1 }
 0x5b8   :  { %v826_v31 = vmul.f32 0.2, %v823_v29 }
 0x5ba   :  { %1007 = vtanh.f32 %v826_v31 }
 0x5c7   :  { %v1008_v32 = vpop.eup %1007 }
 0x5c8   :  { %v829_v33 = vmul.f32 5.0, %v1008_v32  ;;  %v828_v34 = vmax.f32 %v1008_v32, 0.0 }
 0x5ca   :  { %v830_v35 = vmin.f32 %v829_v33, 0.0 }
 0x5cc   :  { %v831_v36 = vadd.f32 %v830_v35, %v828_v34 }
 0x5ce   :  { %833 = vst [vmem:[%s1329_s10 + $0x8] sm:$0xff] %v831_v36 }
 0x5cf   :  { %838 = vsyncpa [#allocation3], 1 }
 0x5d0   :  { %839 = vsyncpa [#allocation5], 1 }
 0x5d1   :  { %840 = vsyncpa [#allocation8], 1 }
 0x5d2   :  { %841 = vsyncpa [#allocation11], 1 }

</bundles_post_ra>
